<compile_context>
chip_gen: v7x
topology: tpu7x:2x2x1
jax: 0.10.0
libtpu: 0.0.40
codegen_flags: <defaults>
</compile_context>

<pallas_src>
import functools

import jax
import jax.numpy as jnp
from jax import lax
from jax.experimental import pallas as pl
from jax.experimental.pallas import tpu as pltpu


def _sdpa_kernel(q_ref, k_ref, v_ref, out_ref, attn_ref, log_attn_ref, *,
                 inv_temperature, valid_lk):
    # Each grid step processes one (batch, q-tile); refs are (1, TQ/Lk, ·) views.
    q = q_ref[0] * inv_temperature          # (TQ, D)  — scale q, not scores
    k = k_ref[0]                            # (Lk_p, D)  — resident across q-tiles
    v = v_ref[0]                            # (Lk_p, Dv_p)

    # scores = (q/T) @ k^T : contract last dims directly on the MXU, no transpose.
    scores = lax.dot_general(
        q, k,
        dimension_numbers=(((1,), (1,)), ((), ())),
        preferred_element_type=jnp.float32)          # (TQ, Lk_p), f32

    # Mask zero-padded key columns so they get ~0 softmax weight.
    if valid_lk < scores.shape[-1]:
        col = lax.broadcasted_iota(jnp.int32, scores.shape, 1)
        scores = jnp.where(col < valid_lk, scores, -1e30)

    # Numerically-stable softmax / log_softmax along the key axis (dim=2 in torch).
    m = jnp.max(scores, axis=-1, keepdims=True)
    shifted = scores - m
    exp_s = jnp.exp(shifted)
    denom = jnp.sum(exp_s, axis=-1, keepdims=True)

    # Store log_softmax first so `shifted`/`scores` can retire before the PV matmul.
    log_attn_ref[0] = (shifted - jnp.log(denom)).astype(log_attn_ref.dtype)

    # Exact per-row reciprocal (approx=False) -> rows sum to 1, torch parity.
    inv = pl.reciprocal(denom)
    attn = exp_s * inv
    attn_ref[0] = attn.astype(attn_ref.dtype)

    # output = attn @ v   (dropout is identity in eval mode)
    out = jnp.dot(attn.astype(v.dtype), v, preferred_element_type=jnp.float32)
    out_ref[0] = out.astype(out_ref.dtype)


def _round_up(x, m):
    return ((x + m - 1) // m) * m


def scaled_dot_product_attention(q, k, v, temperature, *, max_q_tile=512):
    """Pallas TPU scaled dot-product attention.

    q: (B, Lq, D), k: (B, Lk, D), v: (B, Lk, Dv) -> (output, attn, log_attn)
    """
    B, Lq, D = q.shape
    _, Lk, _ = k.shape
    Dv = v.shape[-1]

    in_dt = q.dtype
    out_dt = q.dtype                      # outputs follow input dtype (torch parity)
    in_isz = jnp.dtype(in_dt).itemsize
    out_isz = jnp.dtype(out_dt).itemsize

    # Lane-dense padding: stores along Dv (out) and Lk (attn/log_attn) land on
    # full 128-lane vregs instead of masked partial stores; MXU tiles stay full.
    LANE = 128
    Lk_p = _round_up(Lk, LANE)
    Dv_p = _round_up(Dv, LANE)

    # ---- generation-aware VMEM budget -------------------------------------
    try:
        vmem_cap = int(pltpu.get_tpu_info().vmem_capacity_bytes)
    except Exception:
        vmem_cap = 64 << 20               # conservative: v7x has 64 MiB / TC
    budget = min(int(vmem_cap * 0.75), 100 << 20)

    # double-buffered resident K/V + double-buffered q/out/attn/log_attn tiles
    # + ~5 live TQxLk f32 intermediates (scores/shifted/exp_s/attn/log_attn).
    kv_bytes = 2 * Lk_p * (D + Dv_p) * in_isz
    per_row = (2 * (D * in_isz + Dv_p * out_isz + 2 * Lk_p * out_isz)
               + 5 * Lk_p * 4)

    def fits(tq):
        return kv_bytes + tq * per_row + (2 << 20) <= budget

    # ---- q-tile selection: whole Lq if small, else largest 128/8 multiple --
    lq8 = _round_up(max(Lq, 8), 8)
    TQ = None
    if lq8 <= max_q_tile and fits(lq8):
        TQ = lq8
    if TQ is None:
        tq = (min(max_q_tile, lq8) // LANE) * LANE
        while tq >= LANE:
            if fits(tq):
                TQ = tq
                break
            tq -= LANE
    if TQ is None:
        tq = (min(max_q_tile, lq8) // 8) * 8
        while tq >= 8:
            if fits(tq):
                TQ = tq
                break
            tq -= 8
    if TQ is None:
        # TODO(synk): switch to an Lk-tiled online-softmax path here.
        TQ = 8

    Lq_p = _round_up(lq8, TQ)
    n_q_tiles = Lq_p // TQ

    # Zero-pad inputs to the lane/tile-friendly shapes (padded key columns are
    # masked inside the kernel; padded q rows / v columns are sliced off below).
    def pad_to(x, shape):
        if x.shape == tuple(shape):
            return x
        return jnp.pad(x, [(0, t - s) for s, t in zip(x.shape, shape)])

    q_p = pad_to(q, (B, Lq_p, D))
    k_p = pad_to(k, (B, Lk_p, D))
    v_p = pad_to(v, (B, Lk_p, Dv_p))

    kernel = functools.partial(_sdpa_kernel,
                               inv_temperature=1.0 / float(temperature),
                               valid_lk=Lk)

    out_shapes = (
        jax.ShapeDtypeStruct((B, Lq_p, Dv_p), out_dt),
        jax.ShapeDtypeStruct((B, Lq_p, Lk_p), out_dt),
        jax.ShapeDtypeStruct((B, Lq_p, Lk_p), out_dt),
    )

    grid_spec = pltpu.PrefetchScalarGridSpec(
        num_scalar_prefetch=0,
        grid=(B, n_q_tiles),
        in_specs=[
            # q is tiled along Lq; k/v ignore the q-tile index -> stay resident.
            pl.BlockSpec((1, TQ, D), lambda b, qi: (b, qi, 0)),
            pl.BlockSpec((1, Lk_p, D), lambda b, qi: (b, 0, 0)),
            pl.BlockSpec((1, Lk_p, Dv_p), lambda b, qi: (b, 0, 0)),
        ],
        out_specs=[
            pl.BlockSpec((1, TQ, Dv_p), lambda b, qi: (b, qi, 0)),
            pl.BlockSpec((1, TQ, Lk_p), lambda b, qi: (b, qi, 0)),
            pl.BlockSpec((1, TQ, Lk_p), lambda b, qi: (b, qi, 0)),
        ],
    )

    need = kv_bytes + TQ * per_row + (2 << 20)
    vmem_limit = max(32 << 20, min(budget, int(need * 1.25) + (4 << 20)))

    cost = pl.CostEstimate(
        flops=2 * B * Lq_p * Lk_p * (D + Dv_p),
        transcendentals=B * Lq_p * (Lk_p + 1),      # exp per score + log per row
        bytes_accessed=(B * (Lq_p * D + Lk_p * D + Lk_p * Dv_p) * in_isz
                        + B * Lq_p * (Dv_p + 2 * Lk_p) * out_isz),
    )

    out_p, attn_p, log_attn_p = pl.pallas_call(
        kernel,
        out_shape=out_shapes,
        grid_spec=grid_spec,
        compiler_params=pltpu.CompilerParams(
            dimension_semantics=("parallel", "parallel"),
            vmem_limit_bytes=vmem_limit),
        cost_estimate=cost,
    )(q_p, k_p, v_p)

    # Strip lane / row padding back off (no-op when shapes were already aligned).
    out = out_p[:, :Lq, :Dv]
    attn = attn_p[:, :Lq, :Lk]
    log_attn = log_attn_p[:, :Lq, :Lk]
    return out, attn, log_attn


if __name__ == "__main__":
    # Small deterministic example consistent with the module's bmm semantics.
    # Lq=16 with max_q_tile=8 exercises the q-tiled path (grid=(B, 2)) and the
    # Lk/Dv lane-padding + key-mask path (Lk=8, Dv=32 -> padded to 128).
    B, Lq, Lk, D, Dv = 2, 16, 8, 32, 32
    key = jax.random.PRNGKey(0)
    kq, kk, kv = jax.random.split(key, 3)
    q = jax.random.normal(kq, (B, Lq, D), dtype=jnp.float32)
    k = jax.random.normal(kk, (B, Lk, D), dtype=jnp.float32)
    v = jax.random.normal(kv, (B, Lk, Dv), dtype=jnp.float32)

    temperature = float(D) ** 0.5  # typical choice: sqrt(d_k)

    out, attn, log_attn = scaled_dot_product_attention(
        q, k, v, temperature, max_q_tile=8)
    jax.block_until_ready((out, attn, log_attn))

    # Pure-JAX reference check (highest matmul precision for a stable baseline).
    scores_ref = jnp.einsum("bqd,bkd->bqk", q, k, precision="highest") / temperature
    attn_ref = jax.nn.softmax(scores_ref, axis=2)
    log_attn_ref = jax.nn.log_softmax(scores_ref, axis=2)
    out_ref = jnp.einsum("bqk,bkd->bqd", attn_ref, v, precision="highest")

    # Exact (non-approx) softmax reciprocal -> rows sum to 1.
    assert jnp.allclose(jnp.sum(attn, axis=-1), 1.0, atol=1e-4)
    # Tolerances allow for MXU f32 matmul precision differences vs. XLA.
    assert jnp.allclose(out, out_ref, atol=3e-2, rtol=3e-2)
    assert jnp.allclose(attn, attn_ref, atol=1e-2, rtol=1e-2)
    assert jnp.allclose(log_attn, log_attn_ref, atol=3e-2, rtol=3e-2)

    print("KERNEL_OK")
</pallas_src>

<mosaic_0001>
module attributes {stable_mosaic.version = 11 : i64} {
  func.func @_sdpa_kernel(%arg0: i32, %arg1: i32, %arg2: memref<1x8x32xf32, #tpu.memory_space<vmem>>, %arg3: memref<1x128x32xf32, #tpu.memory_space<vmem>>, %arg4: memref<1x128x128xf32, #tpu.memory_space<vmem>>, %arg5: memref<1x8x128xf32, #tpu.memory_space<vmem>>, %arg6: memref<1x8x128xf32, #tpu.memory_space<vmem>>, %arg7: memref<1x8x128xf32, #tpu.memory_space<vmem>>) attributes {dimension_semantics = [#tpu.dimension_semantics<parallel>, #tpu.dimension_semantics<parallel>], iteration_bounds = array<i64: 2, 2>, scalar_prefetch = 0 : i64, scratch_operands = 0 : i64, tpu.core_type = #tpu.core_type<tc>, window_params = [{transform_indices = @transform_0, window_bounds = array<i64: 1, 8, 32>}, {transform_indices = @transform_1, window_bounds = array<i64: 1, 128, 32>}, {transform_indices = @transform_2, window_bounds = array<i64: 1, 128, 128>}, {transform_indices = @transform_3, window_bounds = array<i64: 1, 8, 128>}, {transform_indices = @transform_4, window_bounds = array<i64: 1, 8, 128>}, {transform_indices = @transform_5, window_bounds = array<i64: 1, 8, 128>}]} {
    %c0 = arith.constant 0 : index
    %c0_0 = arith.constant 0 : index
    %c0_1 = arith.constant 0 : index
    %0 = vector.load %arg2[%c0, %c0_0, %c0_1] : memref<1x8x32xf32, #tpu.memory_space<vmem>>, vector<1x8x32xf32>
    %1 = vector.shape_cast %0 : vector<1x8x32xf32> to vector<8x32xf32>
    %cst = arith.constant 0.176776692 : f32
    %2 = vector.broadcast %cst : f32 to vector<8x32xf32>
    %3 = arith.mulf %1, %2 : vector<8x32xf32>
    %c0_2 = arith.constant 0 : index
    %c0_3 = arith.constant 0 : index
    %c0_4 = arith.constant 0 : index
    %4 = vector.load %arg3[%c0_2, %c0_3, %c0_4] : memref<1x128x32xf32, #tpu.memory_space<vmem>>, vector<1x128x32xf32>
    %5 = vector.shape_cast %4 : vector<1x128x32xf32> to vector<128x32xf32>
    %c0_5 = arith.constant 0 : index
    %c0_6 = arith.constant 0 : index
    %c0_7 = arith.constant 0 : index
    %6 = vector.load %arg4[%c0_5, %c0_6, %c0_7] : memref<1x128x128xf32, #tpu.memory_space<vmem>>, vector<1x128x128xf32>
    %7 = vector.shape_cast %6 : vector<1x128x128xf32> to vector<128x128xf32>
    %cst_8 = arith.constant dense<0.000000e+00> : vector<8x128xf32>
    %8 = tpu.matmul %3, %5, %cst_8 {dimension_numbers = #tpu.dot_dimension_numbers<[1], [1], [0], [0], [0, 0, 1, 0], [], []>} : vector<8x32xf32>, vector<128x32xf32>, vector<8x128xf32> -> vector<8x128xf32>
    %9 = tpu.iota {dimensions = array<i32: 1>} : vector<8x128xi32>
    %c8_i32 = arith.constant 8 : i32
    %10 = vector.broadcast %c8_i32 : i32 to vector<8x128xi32>
    %11 = arith.cmpi slt, %9, %10 : vector<8x128xi32>
    %cst_9 = arith.constant -1.000000e+30 : f32
    %12 = vector.broadcast %cst_9 : f32 to vector<8x128xf32>
    %13 = arith.select %11, %8, %12 : vector<8x128xi1>, vector<8x128xf32>
    %cst_10 = arith.constant dense<0xFF800000> : vector<8xf32>
    %14 = vector.multi_reduction <maximumf>, %13, %cst_10 [1] : vector<8x128xf32> to vector<8xf32>
    %15 = vector.shape_cast %14 : vector<8xf32> to vector<8x1xf32>
    %16 = vector.broadcast %15 : vector<8x1xf32> to vector<8x128xf32>
    %17 = arith.subf %13, %16 : vector<8x128xf32>
    %18 = math.exp %17 : vector<8x128xf32>
    %cst_11 = arith.constant dense<0.000000e+00> : vector<8xf32>
    %19 = vector.multi_reduction <add>, %18, %cst_11 [1] : vector<8x128xf32> to vector<8xf32>
    %20 = vector.shape_cast %19 : vector<8xf32> to vector<8x1xf32>
    %21 = math.log %20 : vector<8x1xf32>
    %22 = vector.broadcast %21 : vector<8x1xf32> to vector<8x128xf32>
    %23 = arith.subf %17, %22 : vector<8x128xf32>
    %c0_12 = arith.constant 0 : index
    %c0_13 = arith.constant 0 : index
    %c0_14 = arith.constant 0 : index
    %24 = vector.load %arg7[%c0_12, %c0_13, %c0_14] : memref<1x8x128xf32, #tpu.memory_space<vmem>>, vector<1x8x128xf32>
    %25 = vector.shape_cast %24 : vector<1x8x128xf32> to vector<8x128xf32>
    %26 = vector.shape_cast %23 : vector<8x128xf32> to vector<1x8x128xf32>
    tpu.vector_store %arg7[%c0_12, %c0_13, %c0_14], %26 {strides = array<i32>} : memref<1x8x128xf32, #tpu.memory_space<vmem>>, vector<1x8x128xf32>,
    %27 = tpu.reciprocal %20 : vector<8x1xf32> -> vector<8x1xf32>
    %28 = vector.broadcast %27 : vector<8x1xf32> to vector<8x128xf32>
    %29 = arith.mulf %18, %28 : vector<8x128xf32>
    %c0_15 = arith.constant 0 : index
    %c0_16 = arith.constant 0 : index
    %c0_17 = arith.constant 0 : index
    %30 = vector.load %arg6[%c0_15, %c0_16, %c0_17] : memref<1x8x128xf32, #tpu.memory_space<vmem>>, vector<1x8x128xf32>
    %31 = vector.shape_cast %30 : vector<1x8x128xf32> to vector<8x128xf32>
    %32 = vector.shape_cast %29 : vector<8x128xf32> to vector<1x8x128xf32>
    tpu.vector_store %arg6[%c0_15, %c0_16, %c0_17], %32 {strides = array<i32>} : memref<1x8x128xf32, #tpu.memory_space<vmem>>, vector<1x8x128xf32>,
    %cst_18 = arith.constant dense<0.000000e+00> : vector<8x128xf32>
    %33 = tpu.matmul %29, %7, %cst_18 {dimension_numbers = #tpu.dot_dimension_numbers<[1], [0], [0], [1], [0, 0, 1, 1], [], []>} : vector<8x128xf32>, vector<128x128xf32>, vector<8x128xf32> -> vector<8x128xf32>
    %c0_19 = arith.constant 0 : index
    %c0_20 = arith.constant 0 : index
    %c0_21 = arith.constant 0 : index
    %34 = vector.load %arg5[%c0_19, %c0_20, %c0_21] : memref<1x8x128xf32, #tpu.memory_space<vmem>>, vector<1x8x128xf32>
    %35 = vector.shape_cast %34 : vector<1x8x128xf32> to vector<8x128xf32>
    %36 = vector.shape_cast %33 : vector<8x128xf32> to vector<1x8x128xf32>
    tpu.vector_store %arg5[%c0_19, %c0_20, %c0_21], %36 {strides = array<i32>} : memref<1x8x128xf32, #tpu.memory_space<vmem>>, vector<1x8x128xf32>,
    return
  }
  func.func @transform_0(%arg0: i32, %arg1: i32) -> (i32, i32, i32) {
    %c0_i32 = arith.constant 0 : i32
    %c0_i32_0 = arith.constant 0 : i32
    return %arg0, %arg1, %c0_i32 : i32, i32, i32
  }
  func.func @transform_1(%arg0: i32, %arg1: i32) -> (i32, i32, i32) {
    %c0_i32 = arith.constant 0 : i32
    %c0_i32_0 = arith.constant 0 : i32
    %c0_i32_1 = arith.constant 0 : i32
    return %arg0, %c0_i32, %c0_i32_0 : i32, i32, i32
  }
  func.func @transform_2(%arg0: i32, %arg1: i32) -> (i32, i32, i32) {
    %c0_i32 = arith.constant 0 : i32
    %c0_i32_0 = arith.constant 0 : i32
    %c0_i32_1 = arith.constant 0 : i32
    return %arg0, %c0_i32, %c0_i32_0 : i32, i32, i32
  }
  func.func @transform_3(%arg0: i32, %arg1: i32) -> (i32, i32, i32) {
    %c0_i32 = arith.constant 0 : i32
    %c0_i32_0 = arith.constant 0 : i32
    return %arg0, %arg1, %c0_i32 : i32, i32, i32
  }
  func.func @transform_4(%arg0: i32, %arg1: i32) -> (i32, i32, i32) {
    %c0_i32 = arith.constant 0 : i32
    %c0_i32_0 = arith.constant 0 : i32
    return %arg0, %arg1, %c0_i32 : i32, i32, i32
  }
  func.func @transform_5(%arg0: i32, %arg1: i32) -> (i32, i32, i32) {
    %c0_i32 = arith.constant 0 : i32
    %c0_i32_0 = arith.constant 0 : i32
    return %arg0, %arg1, %c0_i32 : i32, i32, i32
  }
}

</mosaic_0001>

<bundles_post_ra>
// kernel: tpu_custom_call.1
= control target key start
LH: loop header
LB: loop body
LE: loop exit
PB: predicated region body
PF: predicated region fallthrough
CT: control target
= control target key end

     0   :  { %s1567_s0 = inlined_call_operand.vmem [shape: f32[2,16,32], index: 0, kind: input, shape index: {}]   ;;  %s1568_s1 = inlined_call_operand.vmem [shape: f32[2,128,32], index: 1, kind: input, shape index: {}]   ;;  %s1569_s2 = inlined_call_operand.vmem [shape: f32[2,128,128], index: 2, kind: input, shape index: {}]   ;;  %s1570_s3 = inlined_call_operand.hbm [shape: f32[2,16,128], index: 3, kind: output, shape index: {0}]   ;;  %s1571_s4 = inlined_call_operand.hbm [shape: f32[2,16,128], index: 4, kind: output, shape index: {1}]   ;;  %s1572_s5 = inlined_call_operand.hbm [shape: f32[2,16,128], index: 5, kind: output, shape index: {2}]  }
   0x1   :  { %1575 = sst [smem:[#allocation9_spill]] %s1567_s0 }
   0x2   :  { %1576 = sst [smem:[#allocation10_spill]] %s1568_s1 }
   0x3   :  { %11 = vsyncpa [#allocation3], 0 }
   0x4   :  { %13 = vsyncpa [#allocation3 + $0x1], 0 }
   0x5   :  { %14 = vsyncpa [#allocation5], 0 }
   0x6   :  { %16 = vsyncpa [#allocation5 + $0x1], 0  ;;  %s1264_s18 = smov 0   ;;  %s1266_s19 = smov 0  }
   0x7   :  { %s1268_s20 = smov 0   ;;  %s1270_s21 = smov 0  }
   0x8   :  { %s1272_s22 = smov 0   ;;  %s1274_s23 = smov 0  }
   0x9   :  { %s1276_s24 = smov 0   ;;  %s1278_s25 = smov 0  }
   0xa LB: > { %s778_s26 = sadd.s32 4294967295, %s1226_s25   ;;  %s1573_s27 = sadd.s32 4294967294, %s1226_s25   ;;  %s1226_s25 = sphi %s1278_s25, %s22_s25   ;;  %s1222_s24 = sphi %s1276_s24, %s1591_s24   ;;  %s1218_s23 = sphi %s1274_s23, %s1590_s23   ;;  %s1214_s22 = sphi %s1272_s22, %s1589_s22   ;;  %s1210_s21 = sphi %s1270_s21, %s1588_s21   ;;  %s1206_s20 = sphi %s1268_s20, %s1587_s20   ;;  %s1202_s19 = sphi %s1266_s19, %s1586_s19   ;;  %s1198_s18 = sphi %s1264_s18, %s1585_s18  }
   0xb   : > { %s31_s28 = sadd.s32 1, %s1218_s23  ;;  %s34_s29 = sadd.s32 1, %s1222_s24 }
   0xc   : > { %p32_p0 = scmp.ge.s32.totalorder %s31_s28, 2  ;;  %p133_p1 = scmp.ne.s32.totalorder %s1206_s20, %s1202_s19 }
   0xd   : > { %p134_p2 = scmp.eq.s32.totalorder %s778_s26, 3  ;;  %p139_p5 = scmp.ne.s32.totalorder %s1202_s19, %s1198_s18 }
   0xe   : > { %s1593_s28 = smov (%p32_p0, %s31_s28), 0  ;;  %s1595_s29 = smov (!%p32_p0, %s34_s29), %s1222_s24 }
   0xf   : > { %s119_s30 = ssub.s32 %s1218_s23, %s1593_s28  ;;  %p1317_p3 = por %p134_p2, %p133_p1 }
  0x10   : > { %p36_p4 = scmp.ge.s32.totalorder %s1595_s29, 2  ;;  %p140_p6 = scmp.eq.s32.totalorder %s1573_s27, 3 }
  0x11   : > { %p782_p7 = scmp.ge.s32.totalorder %s1226_s25, 1  ;;  %p241_p9 = scmp.lt.s32.totalorder %s1226_s25, 5 }
  0x12   : > { %s1597_s29 = smov (%p36_p4, %s1595_s29), 0  ;;  %p1328_p8 = por %p140_p6, %p139_p5 }
  0x13   : > { %s118_s8 = ssub.s32 %s1222_s24, %s1597_s29  ;;  %s123_s9 = sadd.s32 1, %s1206_s20 }
  0x14   : > { %s120_s10 = sor.u32 %s119_s30, %s118_s8  ;;  %p242_p10 = pnand %p782_p7, %p241_p9 }
  0x15   : > { %p121_p11 = scmp.eq.s32.totalorder %s120_s10, 0  ;;  %p292_p12 = scmp.lt.s32.totalorder (!%p242_p10), %s1214_s22, 1  ;;  %v1228_v0 = vmov (!%p242_p10), 0.0|0.0   ;;  %vm1229_vm0 = vmmov (!%p242_p10), 0   ;;  %v1230_v1 = vmov (!%p242_p10), 0.0   ;;  %vm344_vm1 = vcmask (!%p242_p10), 261120  }
  0x16   : > { %245 = sbr.rel (%p242_p10) target bundleno = 851 (0x353), region = 32  ;;  %926 = vmatprep.subr.bf16.mxu0 (!%p242_p10), %v1228_v0  ;;  %888 = vmatprep.mubr.msk.f32.mxu0 (!%p242_p10), %vm1229_vm0, %v1230_v1  ;;  %s1579_s1 = sld [smem:[#allocation10_spill]] (!%p242_p10)  ;;  %vm1357_vm2 = vmpackc.low (!%p242_p10), %vm344_vm1, %vm344_vm1  ;;  %v466_v29 = vlaneseq (!%p242_p10) }
  0x17   : > { %s1337_s11 = scalar_select %p121_p11, %s1206_s20, %s123_s9  }
  0x18   : > { %958 = vmatprep.subr.bf16.mxu1 (!%p242_p10), %v1228_v0  ;;  %923 = vmatprep.mubr.msk.f32.mxu1 (!%p242_p10), %vm1229_vm0, %v1230_v1  ;;  %p294_p13 = scmp.lt.s32.totalorder (!%p242_p10), %s1210_s21, 1  ;;  %s1582_s0 = sld [smem:[#allocation9_spill]] (!%p242_p10)  ;;  %v467_v30 = vand.u32 (!%p242_p10), 127, %v466_v29 }
  0x19   : > { %s812_s10 = sshll.u32 (!%p242_p10), %s1214_s22, 1 }
  0x1a   : > { %vm468_vm3 = vcmp.lt.s32.totalorder (!%p242_p10), %v467_v30, 8  ;;  %s577_s14 = sadd.s32 (!%p242_p10), %s1210_s21, %s812_s10 }
  0x1d   : > { %s1342_s12 = scalar_select %p292_p12, %s1214_s22, 1 }
  0x1e   : > { %s295_s17 = scalar_select %p294_p13, %s1210_s21, 1 }
  0x1f   : > { %s820_s13 = sshll.u32 %s1342_s12, 7  ;;  %s786_s30 = sshll.u32 %s1342_s12, 1 }
  0x20   : > { %s1351_s16 = scalar_lea.vmem %s1579_s1, %s820_s13  ;;  %s297_s8 = sadd.s32 %s786_s30, %s295_s17 }
  0x21   : > { %v312_v2 = vld [vmem:[%s1351_s16] sm:$0xff]  ;;  %v313_v3 = vld [vmem:[%s1351_s16 + $0x8] sm:$0xff]  ;;  %v314_v6 = vld [vmem:[%s1351_s16 + $0x10] sm:$0xff]  ;;  %s787_s9 = sshll.u32 %s297_s8, 3  ;;  %s1410_s30 = scalar_lea.vmem %s1569_s2, %s820_s13 }
  0x22   : > { %v927_v5 = vpack.c.bf16 %v313_v3, %v312_v2  ;;  %v315_v7 = vld [vmem:[%s1351_s16 + $0x18] sm:$0xff]  ;;  %v316_v9 = vld [vmem:[%s1351_s16 + $0x20] sm:$0xff]  ;;  %v317_v10 = vld [vmem:[%s1351_s16 + $0x28] sm:$0xff]  ;;  %s299_s15 = scalar_lea.vmem %s1582_s0, %s787_s9  ;;  %s1574_s12 = sand.u32 1, %s1202_s19  }
  0x23   : > { %v931_v8 = vpack.c.bf16 %v315_v7, %v314_v6  ;;  %v935_v11 = vpack.c.bf16 %v317_v10, %v316_v9  ;;  %v318_v12 = vld [vmem:[%s1351_s16 + $0x30] sm:$0xff]  ;;  %v319_v13 = vld [vmem:[%s1351_s16 + $0x38] sm:$0xff]  ;;  %v320_v15 = vld [vmem:[%s1351_s16 + $0x40] sm:$0xff]  ;;  %s1438_s13 = sshll.u32 %s1574_s12, 3  ;;  %s1231_s21 = smov [#allocation4]  }
  0x24   : > { %929 = vmatpush3.bf16.xpose.msk.msra.mxu0 %vm1357_vm2, %v927_v5  ;;  %v939_v14 = vpack.c.bf16 %v319_v13, %v318_v12  ;;  %v321_v16 = vld [vmem:[%s1351_s16 + $0x48] sm:$0xff]  ;;  %v322_v18 = vld [vmem:[%s1351_s16 + $0x50] sm:$0xff]  ;;  %v323_v19 = vld [vmem:[%s1351_s16 + $0x58] sm:$0xff]  ;;  %s284_s8 = scalar_lea.vmem [#allocation4], %s1438_s13  ;;  %s291_s9 = scalar_lea.vmem [#allocation6], %s1438_s13 }
  0x25   : > { %930 = vmatprep.subr.bf16.mxu0 %v1228_v0  ;;  %v943_v17 = vpack.c.bf16 %v321_v16, %v320_v15  ;;  %v947_v20 = vpack.c.bf16 %v323_v19, %v322_v18  ;;  %v324_v21 = vld [vmem:[%s1351_s16 + $0x60] sm:$0xff]  ;;  %v325_v22 = vld [vmem:[%s1351_s16 + $0x68] sm:$0xff]  ;;  %v326_v24 = vld [vmem:[%s1351_s16 + $0x70] sm:$0xff]  ;;  %s596_s12 = sshll.u32 %s284_s8, 4  ;;  %s1076_s22 = sshll.u32 %s1231_s21, 4  ;;  %s597_s12 = int_to_ptr.vmem [resolvable:$true] %s596_s12  ;;  %s1077_s22 = int_to_ptr.vmem [resolvable:$false] %s1076_s22 }
  0x26   : > { %v951_v23 = vpack.c.bf16 %v325_v22, %v324_v21  ;;  %v327_v25 = vld [vmem:[%s1351_s16 + $0x78] sm:$0xff]  ;;  %v310_v27 = vld [vmem:[%s299_s15] sm:$0xff]  ;;  %v329_v35 = vld [vmem:[%s1410_s30 + $0x8] sm:$0xff]  ;;  %s1448_s15 = sand.u32 1, %s778_s26   ;;  %s1450_s16 = sshll.u32 %s577_s14, 7 }
  0x27   : > { %v955_v26 = vpack.c.bf16 %v327_v25, %v326_v24  ;;  %v311_v28 = vmul.f32 0.17677669, %v310_v27  ;;  %v328_v34 = vld [vmem:[%s1410_s30] sm:$0xff]  ;;  %v330_v36 = vld [vmem:[%s1410_s30 + $0x10] sm:$0xff]  ;;  %v331_v38 = vld [vmem:[%s1410_s30 + $0x18] sm:$0xff]  ;;  %s1456_s27 = scalar_lea.hbm %s1571_s4, %s1450_s16  ;;  %s561_s0 = scalar_lea.sflag [#allocation5], %s1448_s15 }
  0x28   : > { %v959_v37 = vpack.c.bf16 %v329_v35, %v328_v34  ;;  %v962_v39 = vpack.c.bf16 %v331_v38, %v330_v36  ;;  %v332_v40 = vld [vmem:[%s1410_s30 + $0x20] sm:$0xff]  ;;  %v333_v41 = vld [vmem:[%s1410_s30 + $0x28] sm:$0xff]  ;;  %v334_v43 = vld [vmem:[%s1410_s30 + $0x30] sm:$0xff]  ;;  %s1072_s1 = scalar_lea.vmem %s597_s12, 128  ;;  %s1078_s26 = scalar_lea.vmem %s1077_s22, 256 }
  0x29   : > { %v965_v42 = vpack.c.bf16 %v333_v41, %v332_v40  ;;  %v335_v44 = vld [vmem:[%s1410_s30 + $0x38] sm:$0xff]  ;;  %v336_v46 = vld [vmem:[%s1410_s30 + $0x40] sm:$0xff]  ;;  %v337_v47 = vld [vmem:[%s1410_s30 + $0x48] sm:$0xff]  ;;  %p1073_p0 = scmp.ne.s32.totalorder %s597_s12, %s1072_s1  ;;  %p1079_p4 = scmp.lt.s32.totalorder %s597_s12, %s1077_s22 }
  0x2a   : > { %960 = vmatpush3.bf16.msra.mxu1 %v959_v37  ;;  %v968_v45 = vpack.c.bf16 %v335_v44, %v334_v43  ;;  %v971_v48 = vpack.c.bf16 %v337_v47, %v336_v46  ;;  %v338_v53 = vld [vmem:[%s1410_s30 + $0x50] sm:$0xff]  ;;  %v339_v54 = vld [vmem:[%s1410_s30 + $0x58] sm:$0xff]  ;;  %v340_v56 = vld [vmem:[%s1410_s30 + $0x60] sm:$0xff]  ;;  %p1080_p5 = scmp.lt.s32.totalorder %s1078_s26, %s1072_s1 }
  0x2b   : > { %961 = vmatprep.subr.bf16.mxu1 %v1228_v0  ;;  %v974_v55 = vpack.c.bf16 %v339_v54, %v338_v53  ;;  %v341_v57 = vld [vmem:[%s1410_s30 + $0x68] sm:$0xff]  ;;  %v342_v59 = vld [vmem:[%s1410_s30 + $0x70] sm:$0xff]  ;;  %v343_v60 = vld [vmem:[%s1410_s30 + $0x78] sm:$0xff]  ;;  %p1074_p1 = pnand %p1073_p0, %p1317_p3 }
  0x2c   : > { %933 = vmatpush3.bf16.xpose.msk.msra.mxu0 %vm1357_vm2, %v931_v8  ;;  %v977_v58 = vpack.c.bf16 %v341_v57, %v340_v56  ;;  %v980_v61 = vpack.c.bf16 %v343_v60, %v342_v59  ;;  %p1081_p6 = por %p1080_p5, %p1079_p4 }
  0x2d   : > { %934 = vmatprep.subr.bf16.mxu0 %v1228_v0  ;;  %p1075_p2 = pneg %p1074_p1 }
  0x2e   : > { %963 = vmatpush3.bf16.msra.mxu1 %v962_v39 }
  0x2f   : > { %964 = vmatprep.subr.bf16.mxu1 %v1228_v0  ;;  %p1082_p7 = pnand %p1081_p6, %p1075_p2 }
  0x32   : > { %966 = vmatpush3.bf16.msra.mxu1 %v965_v42 }
  0x33   : > { %967 = vmatprep.subr.bf16.mxu1 %v1228_v0 }
  0x34   : > { %937 = vmatpush3.bf16.xpose.msk.msra.mxu0 %vm1357_vm2, %v935_v11 }
  0x35   : > { %938 = vmatprep.subr.bf16.mxu0 %v1228_v0 }
  0x36   : > { %969 = vmatpush3.bf16.msra.mxu1 %v968_v45 }
  0x37   : > { %970 = vmatprep.subr.bf16.mxu1 %v1228_v0 }
  0x3a   : > { %972 = vmatpush3.bf16.msra.mxu1 %v971_v48 }
  0x3b   : > { %973 = vmatprep.subr.bf16.mxu1 %v1228_v0 }
  0x3c   : > { %941 = vmatpush3.bf16.xpose.msk.msra.mxu0 %vm1357_vm2, %v939_v14 }
  0x3d   : > { %942 = vmatprep.subr.bf16.mxu0 %v1228_v0 }
  0x3e   : > { %975 = vmatpush3.bf16.msra.mxu1 %v974_v55 }
  0x3f   : > { %976 = vmatprep.subr.bf16.mxu1 %v1228_v0 }
  0x42   : > { %978 = vmatpush3.bf16.msra.mxu1 %v977_v58 }
  0x43   : > { %979 = vmatprep.subr.bf16.mxu1 %v1228_v0 }
  0x44   : > { %945 = vmatpush3.bf16.xpose.msk.msra.mxu0 %vm1357_vm2, %v943_v17 }
  0x45   : > { %946 = vmatprep.subr.bf16.mxu0 %v1228_v0 }
  0x46   : > { %981 = vmatpush3.bf16.msra.mxu1 %v980_v61 }
  0x4c   : > { %949 = vmatpush3.bf16.xpose.msk.msra.mxu0 %vm1357_vm2, %v947_v20 }
  0x4d   : > { %950 = vmatprep.subr.bf16.mxu0 %v1228_v0 }
  0x54   : > { %953 = vmatpush3.bf16.xpose.msk.msra.mxu0 %vm1357_vm2, %v951_v23 }
  0x55   : > { %954 = vmatprep.subr.bf16.mxu0 %v1228_v0 }
  0x5c   : > { %957 = vmatpush3.bf16.xpose.msk.msra.mxu0 %vm1357_vm2, %v955_v26 }
  0x63   : > { %889 = vmatmul.mubr.msk.f32.vlgmr.msra.gmra.mrb[0].mxu0 %vm344_vm1, %v311_v28 }
 0x136   : > { %v462_v31 = vpop.f32.mrb[0].mxu0 }
 0x137   : > { %v890_v32 = vpop.f32.mrb[1].mxu0  ;;  %v469_v33 = vsel %vm468_vm3, %v462_v31, -1e+30 }
 0x138   : > { %470 = vmax.xlane.f32.xlu0 %v469_v33 }
 0x1c5   : > { %v471_v49 = vpop.xlane.xlu0 %470 }
 0x1c6   : > { %v472_v50 = vsub.f32 %v469_v33, %v471_v49 }
 0x1c8   : > { %v473_v51 = vmul.f32 1.442695, %v472_v50 }
 0x1ca   : > { %1066 = vpow2.f32 %v473_v51 }
 0x1d4   : > { %v1067_v52 = vpop.eup %1066 }
 0x1d5   : > { %475 = vadd.xlane.f32.xlu0 %v1067_v52 }
 0x262   : > { %v476_v62 = vpop.xlane.xlu0 %475 }
 0x263   : > { %1068 = vlog2.f32 %v476_v62 }
 0x264   : > { %1070 = vrcp.f32 %v476_v62 }
 0x26d   : > { %v1069_v63 = vpop.eup %1068 }
 0x26e   : > { %v1071_v1 = vpop.eup %1070  ;;  %v478_v0 = vmul.f32 0.6931472, %v1069_v63 }
 0x26f   : > { %v482_v2 = vmul.f32 %v1071_v1, %v1067_v52 }
 0x270   : > { %v479_v3 = vsub.f32 %v472_v50, %v478_v0 }
 0x271   : > { %924 = vmatmul.mubr.f32.vlgmr.msra.gmra.mrb[0].mxu1 %v482_v2  ;;  %483 = vst [vmem:[%s284_s8] sm:$0xff] %v482_v2 }
 0x272   : > { %480 = vst [vmem:[%s291_s9] sm:$0xff] %v479_v3 }
 0x273   : > { %1085 = shalt.err (!%p1082_p7)
}
 0x274   : > { %s1086_s8 = scalar_lea.hbm %s1456_s27, 128  ;;  %s1090_s17 = scalar_lea.hbm %s1571_s4, 512 }
 0x275   : > { %p1087_p9 = scmp.ne.s32.totalorder %s1456_s27, %s1086_s8  ;;  %p1091_p12 = scmp.lt.u32.totalorder %s1456_s27, %s1571_s4 }
 0x276   : > { %p1092_p13 = scmp.lt.u32.totalorder %s1090_s17, %s1086_s8  ;;  %p1094_p1 = scmp.lt.u32.totalorder %s1086_s8, %s1456_s27 }
 0x277   : > { %p1088_p10 = pnand %p1087_p9, %p1317_p3 }
 0x278   : > { %p1093_p0 = por %p1092_p13, %p1091_p12 }
 0x279   : > { %p1089_p11 = pneg %p1088_p10 }
 0x27a   : > { %p1095_p2 = por %p1094_p1, %p1093_p0 }
 0x27c   : > { %p1096_p4 = pnand %p1095_p2, %p1089_p11 }
 0x27e   : > { %1099 = shalt.err (!%p1096_p4)
}
 0x27f   : > { %983 = dma.vmem_to_hbm [thread:$0]  (%p1317_p3), %s597_s12, 128, %s1456_s27, %s561_s0  }
 0x280   : > { %s1482_s26 = scalar_lea.hbm %s1572_s5, %s1450_s16  ;;  %s611_s10 = sshll.u32 %s291_s9, 4  ;;  %s612_s10 = int_to_ptr.vmem [resolvable:$true] %s611_s10 }
 0x281   : > { %s1100_s8 = scalar_lea.vmem %s612_s10, 128  ;;  %s1232_s14 = smov [#allocation6]  }
 0x282   : > { %p1101_p5 = scmp.ne.s32.totalorder %s612_s10, %s1100_s8  ;;  %s1104_s17 = sshll.u32 %s1232_s14, 4  ;;  %s1105_s17 = int_to_ptr.vmem [resolvable:$false] %s1104_s17 }
 0x283   : > { %s1106_s30 = scalar_lea.vmem %s1105_s17, 256  ;;  %p1107_p9 = scmp.lt.s32.totalorder %s612_s10, %s1105_s17 }
 0x284   : > { %p1102_p6 = pnand %p1101_p5, %p1317_p3  ;;  %p1108_p10 = scmp.lt.s32.totalorder %s1106_s30, %s1100_s8 }
 0x286   : > { %p1103_p7 = pneg %p1102_p6  ;;  %p1109_p11 = por %p1108_p10, %p1107_p9 }
 0x288   : > { %p1110_p12 = pnand %p1109_p11, %p1103_p7 }
 0x28a   : > { %1113 = shalt.err (!%p1110_p12)
}
 0x28b   : > { %s1114_s27 = scalar_lea.hbm %s1482_s26, 128  ;;  %s1118_s21 = scalar_lea.hbm %s1572_s5, 512 }
 0x28c   : > { %p1115_p13 = scmp.ne.s32.totalorder %s1482_s26, %s1114_s27  ;;  %p1119_p2 = scmp.lt.u32.totalorder %s1482_s26, %s1572_s5 }
 0x28d   : > { %p1120_p4 = scmp.lt.u32.totalorder %s1118_s21, %s1114_s27  ;;  %p1122_p6 = scmp.lt.u32.totalorder %s1114_s27, %s1482_s26 }
 0x28e   : > { %p1116_p0 = pnand %p1115_p13, %p1317_p3 }
 0x28f   : > { %p1121_p5 = por %p1120_p4, %p1119_p2 }
 0x290   : > { %p1117_p1 = pneg %p1116_p0 }
 0x291   : > { %p1123_p7 = por %p1122_p6, %p1121_p5 }
 0x293   : > { %p1124_p9 = pnand %p1123_p7, %p1117_p1 }
 0x295   : > { %1127 = shalt.err (!%p1124_p9)
}
 0x296   : > { %984 = dma.vmem_to_hbm [thread:$0]  (%p1317_p3), %s612_s10, 128, %s1482_s26, %s561_s0  }
 0x297   : > { %s277_s8 = scalar_lea.vmem [#allocation2], %s1438_s13  ;;  %s1512_s27 = scalar_lea.hbm %s1570_s3, %s1450_s16 }
 0x298   : > { %s581_s14 = sshll.u32 %s277_s8, 4  ;;  %s1583_s15 = sand.u32 1, %s1202_s19   ;;  %s1506_s14 = int_to_ptr.vmem [resolvable:$true] %s581_s14 }
 0x299   : > { %s556_s12 = scalar_lea.sflag [#allocation3], %s1583_s15  ;;  %s1128_s9 = scalar_lea.vmem %s1506_s14, 128 }
 0x29a   : > { %p1129_p10 = scmp.ne.s32.totalorder %s1506_s14, %s1128_s9  ;;  %s1233_s0 = smov [#allocation2]  }
 0x29b   : > { %s1132_s13 = sshll.u32 %s1233_s0, 4  ;;  %s1133_s13 = int_to_ptr.vmem [resolvable:$false] %s1132_s13 }
 0x29c   : > { %p1130_p11 = pnand %p1129_p10, %p1317_p3  ;;  %s1134_s26 = scalar_lea.vmem %s1133_s13, 256 }
 0x29d   : > { %p1135_p13 = scmp.lt.s32.totalorder %s1506_s14, %s1133_s13  ;;  %p1136_p0 = scmp.lt.s32.totalorder %s1134_s26, %s1128_s9 }
 0x29e   : > { %p1131_p12 = pneg %p1130_p11 }
 0x29f   : > { %p1137_p1 = por %p1136_p0, %p1135_p13 }
 0x2a1   : > { %p1138_p2 = pnand %p1137_p1, %p1131_p12 }
 0x344   : > { %v550_v4 = vpop.f32.mrb[0].mxu1 }
 0x345   : > { %554 = vst [vmem:[%s277_s8] sm:$0xff] %v550_v4  ;;  %v925_v5 = vpop.f32.mrb[1].mxu1 }
 0x346   : > { %1141 = shalt.err (!%p1138_p2)
}
 0x347   : > { %s1142_s16 = scalar_lea.hbm %s1512_s27, 128  ;;  %s1146_s1 = scalar_lea.hbm %s1570_s3, 512 }
 0x348   : > { %p1143_p4 = scmp.ne.s32.totalorder %s1512_s27, %s1142_s16  ;;  %p1147_p7 = scmp.lt.u32.totalorder %s1512_s27, %s1570_s3 }
 0x349   : > { %p1148_p9 = scmp.lt.u32.totalorder %s1146_s1, %s1142_s16  ;;  %p1150_p11 = scmp.lt.u32.totalorder %s1142_s16, %s1512_s27 }
 0x34a   : > { %p1144_p5 = pnand %p1143_p4, %p1317_p3 }
 0x34b   : > { %p1149_p10 = por %p1148_p9, %p1147_p7 }
 0x34c   : > { %p1145_p6 = pneg %p1144_p5 }
 0x34d   : > { %p1151_p12 = por %p1150_p11, %p1149_p10 }
 0x34f   : > { %p1152_p13 = pnand %p1151_p12, %p1145_p6 }
 0x351   : > { %1155 = shalt.err (!%p1152_p13)
}
 0x352   : > { %982 = dma.vmem_to_hbm [thread:$0]  (%p1317_p3), %s1506_s14, 128, %s1512_s27, %s556_s12  }
 0x353 PF: > { %p998_p0 = scmp.ge.s32.totalorder %s1226_s25, 2  ;;  %s623_s17 = sand.u32 1, %s1198_s18  }
 0x354   : > { %s624_s30 = scalar_lea.sflag [#allocation3], %s623_s17 }
 0x355   : > { %p989_p1 = pnand %p998_p0, %p1328_p8 }
 0x357   : > { %1189 = dma.done.wait (!%p989_p1), %s624_s30, 128  }
 0x358   : > { %1191 = vsyncadd (!%p989_p1), %s624_s30, 4294967168  ;;  %s1584_s15 = sadd.s32 4294967294, %s1226_s25  }
 0x359   : > { %s632_s9 = sand.u32 1, %s1584_s15  }
 0x35a   : > { %s633_s0 = scalar_lea.sflag [#allocation5], %s632_s9 }
 0x35b   : > { %1193 = dma.done.wait (!%p989_p1), %s633_s0, 256  }
 0x35c   : > { %1195 = vsyncadd (!%p989_p1), %s633_s0, 4294967040  ;;  %s22_s25 = sadd.s32 1, %s1226_s25   ;;  %s1585_s18 = smov %s1202_s19 }
 0x35d   : > { %p19_p3 = scmp.ge.s32.totalorder %s22_s25, 6   ;;  %s1586_s19 = smov %s1206_s20 }
 0x35e   : > { %s1587_s20 = smov %s1337_s11  ;;  %s1588_s21 = smov %s1218_s23 }
 0x35f   : > { %s1589_s22 = smov %s1222_s24  ;;  %s1590_s23 = smov %s1593_s28 }
 0x360   : > { %s1591_s24 = smov %s1597_s29  ;;  %21 = sbr.rel (!%p19_p3) target bundleno = 10 (0xa), region = 105 }
 0x367   :  { %647 = vsyncpa [#allocation3], 1 }
 0x368   :  { %649 = vsyncpa [#allocation3 + $0x1], 1 }
 0x369   :  { %650 = vsyncpa [#allocation5], 1 }
 0x36a   :  { %652 = vsyncpa [#allocation5 + $0x1], 1 }

</bundles_post_ra>
